<compile_context>
chip_gen: v7x
topology: tpu7x:2x2x1
jax: 0.10.0
libtpu: 0.0.40
codegen_flags: <defaults>
</compile_context>

<pallas_src>
import functools
import math

import jax
import jax.numpy as jnp
import numpy as np
from jax.experimental import pallas as pl
from jax.experimental.pallas import tpu as pltpu

CONV_PAD = 2      # nn.Conv1d(..., padding=2)
KERNEL_SIZE1 = 5  # implied by the output-dim arithmetic in __init__
BN_EPS = 1e-5


# ---------------------------------------------------------------------------
# Static length schedule and avg-pool matrices (numpy, built once)
# ---------------------------------------------------------------------------
def _pooled_len(L, pool):
    return (L + 1) // 2 if pool == "avg" else L // 2   # SAME/2 vs MaxPool1d(2,2)


def _length_schedule(L0, pools):
    Ls = [L0]
    for p in pools:
        Ls.append(_pooled_len(Ls[-1], p))
    return tuple(Ls)


def build_avg_pool_matrices(B, L0, kp, pools):
    """Constant matrices for the avg-pool layers only.  Each maps the
    batch-folded conv-output rows (Lc = B*Lp - (K-1)) directly to the NEXT
    layer's zero-padded input slab (or to the final output rows if last),
    fusing reflect SAME pad + AvgPool1d(kp, 2) + de-interleave + zero re-pad."""
    assert 2 * CONV_PAD == KERNEL_SIZE1 - 1, "conv must preserve length"
    Ls = _length_schedule(L0, pools)
    mats, meta = [], []
    for i, pool in enumerate(pools):
        L, L_out = Ls[i], Ls[i + 1]
        Lp = L + 2 * CONV_PAD
        Lc = B * Lp - (KERNEL_SIZE1 - 1)
        last = i == len(pools) - 1
        if pool == "max":
            # static safety checks for the in-kernel max-pool selection path
            assert 2 * L_out <= L
            assert (B - 1) * Lp + 2 * (L_out - 1) + 1 <= Lc - 1
            continue
        p = max(0, (L_out - 1) * 2 + kp - L)
        pad_l, pad_r = p // 2, p - p // 2
        assert pad_l <= L - 1 and pad_r <= L - 1, \
            "reflect pad would need multiple reflections"
        T = B * L_out if last else B * (L_out + 2 * CONV_PAD)
        M = np.zeros((T, Lc), np.float32)
        for b in range(B):
            for j in range(L_out):
                orow = (b * L_out + j if last
                        else b * (L_out + 2 * CONV_PAD) + CONV_PAD + j)
                for t in range(kp):
                    v = 2 * j + t - pad_l
                    if v < 0:                       # PyTorch F.pad 'reflect'
                        v = -v
                    elif v >= L:
                        v = 2 * (L - 1) - v
                    M[orow, b * Lp + v] += 1.0 / kp
        mats.append(M)
        meta.append((T, Lc))
    assert mats, "expected at least one avg-pool layer"
    Tm = max(m.shape[0] for m in mats)
    Ym = max(m.shape[1] for m in mats)
    packed = np.zeros((len(mats), Tm, Ym), np.float32)
    for i, m in enumerate(mats):
        packed[i, : m.shape[0], : m.shape[1]] = m
    return jnp.asarray(packed), tuple(meta), Ls


# ---------------------------------------------------------------------------
# Parameter setup + packing (plain JAX glue, done once)
# ---------------------------------------------------------------------------
def init_layer_params(key, cin, cout, K):
    kw, kb, kg, kbe, km, kv = jax.random.split(key, 6)
    bound = 1.0 / math.sqrt(cin * K)
    W = jax.random.uniform(kw, (cout, cin, K), jnp.float32, -bound, bound)  # torch layout
    b = jax.random.uniform(kb, (cout,), jnp.float32, -bound, bound)
    gamma = 1.0 + 0.1 * jax.random.normal(kg, (cout,), jnp.float32)
    beta = 0.1 * jax.random.normal(kbe, (cout,), jnp.float32)
    mean = 0.1 * jax.random.normal(km, (cout,), jnp.float32)
    var = jnp.abs(jax.random.normal(kv, (cout,), jnp.float32)) + 0.5
    scale = gamma / jnp.sqrt(var + BN_EPS)
    shift = beta + scale * (b - mean)          # fold conv bias + BN mean/beta
    w_kic = jnp.transpose(W, (2, 1, 0))        # (K, Cin, Cout)
    return w_kic, scale.reshape(1, cout), shift.reshape(1, cout)


def pack_params(layer_params, C):
    """Pack every layer's conv weight (BN scale folded in, Cin zero-padded to C,
    im2col layout (K*C, Cout)) into one (n_layers, K*C, C) slab, and every
    per-layer shift into one (n_layers, C) slab."""
    ws, shifts = [], []
    for w_kic, scale, shift in layer_params:
        K, cin, cout = w_kic.shape
        assert cout == C and cin <= C
        w = jnp.pad(w_kic, ((0, 0), (0, C - cin), (0, 0)))          # (K, C, Cout)
        w = (w * scale.reshape(1, 1, cout)).reshape(K * C, cout)    # fold BN scale
        ws.append(w)
        shifts.append(shift.reshape(1, cout))
    return jnp.stack(ws, 0), jnp.concatenate(shifts, 0)


# ---------------------------------------------------------------------------
# Fused Pallas kernel: 4 x (conv + BN(eval) + ReLU + pool), VMEM-resident
# ---------------------------------------------------------------------------
def _make_fused_kernel(B, C, pools, Ls, avg_meta):
    K = KERNEL_SIZE1
    n_layers = len(pools)

    def kernel(x_ref, w_ref, shift_ref, pm_ref, o_ref, *slab_refs):
        S = x_ref[...]                       # (B*(L0+2*PAD), C) padded input slab
        avg_idx = 0
        slab_idx = 0
        for li, pool in enumerate(pools):    # small static loop: fully unrolled
            L, L_out = Ls[li], Ls[li + 1]
            Lp = L + 2 * CONV_PAD
            Lc = B * Lp - (K - 1)
            last = li == n_layers - 1

            # Conv1d(k=5, pad=2) + BN(eval) + ReLU as ONE MXU dot via im2col.
            X2 = jnp.concatenate([S[k:k + Lc, :] for k in range(K)], axis=1)  # (Lc, K*C)
            Y = jnp.dot(X2, w_ref[li], preferred_element_type=jnp.float32)    # (Lc, C)
            Y = jnp.maximum(Y + shift_ref[li:li + 1, :], 0.0)

            if pool == "avg":
                # reflect-SAME avg pool + de-interleave + zero re-pad: one matmul
                T, Yr = avg_meta[avg_idx]
                M = pm_ref[avg_idx][0:T, 0:Yr]
                avg_idx += 1
                nxt = jnp.dot(M, Y, preferred_element_type=jnp.float32)
                if last:
                    o_ref[...] = nxt
                else:
                    S = nxt                   # already the next layer's padded slab
            else:
                # MaxPool1d(2,2): elementwise max of adjacent rows, then static
                # stride-2 row selection (no selection matmul).
                Mx = jnp.maximum(Y[0:Lc - 1, :], Y[1:Lc, :])
                if last:
                    for b in range(B):
                        for j in range(L_out):
                            o_ref[b * L_out + j:b * L_out + j + 1, :] = \
                                Mx[b * Lp + 2 * j:b * Lp + 2 * j + 1, :]
                else:
                    slab = slab_refs[slab_idx]
                    slab_idx += 1
                    Lp_next = L_out + 2 * CONV_PAD
                    slab[...] = jnp.zeros_like(slab)     # zero conv-pad rows
                    for b in range(B):
                        for j in range(L_out):
                            r = b * Lp_next + CONV_PAD + j
                            slab[r:r + 1, :] = Mx[b * Lp + 2 * j:b * Lp + 2 * j + 1, :]
                    S = slab[...]

    return kernel


@functools.partial(jax.jit, static_argnames=("pools", "avg_meta"))
def feature_extractor_forward(x_ncl, w_packed, shift_packed, pm_packed, *,
                              pools, avg_meta):
    """x_ncl: (B, Cin, L) like PyTorch NCL.  Returns (B, feature_out_dim)."""
    B, Cin, L0 = x_ncl.shape
    C = w_packed.shape[-1]
    Ls = _length_schedule(L0, pools)
    L_last = Ls[-1]

    # NCL -> channels-last, zero channel-pad to C, insert per-batch zero conv
    # padding rows, fold batch into sublanes: one (B*(L0+2*PAD), C) slab.
    x = jnp.transpose(x_ncl.astype(jnp.float32), (0, 2, 1))
    x = jnp.pad(x, ((0, 0), (CONV_PAD, CONV_PAD), (0, C - Cin)))
    x_slab = x.reshape(B * (L0 + 2 * CONV_PAD), C)

    def full_spec(shape):
        zeros = (0,) * len(shape)
        return pl.BlockSpec(shape, lambda i, _z=zeros: _z)

    # one zero-padded slab scratch per non-final max-pool layer
    scratch_shapes = []
    for i, pool in enumerate(pools[:-1]):
        if pool == "max":
            scratch_shapes.append(
                pltpu.VMEM((B * (Ls[i + 1] + 2 * CONV_PAD), C), jnp.float32))

    kernel = _make_fused_kernel(B, C, pools, Ls, avg_meta)
    inputs = (x_slab, w_packed, shift_packed, pm_packed)
    out = pl.pallas_call(
        kernel,
        out_shape=jax.ShapeDtypeStruct((B * L_last, C), jnp.float32),
        grid=(1,),                                  # single launch; all in VMEM
        in_specs=[full_spec(a.shape) for a in inputs],
        out_specs=full_spec((B * L_last, C)),
        scratch_shapes=scratch_shapes,
        compiler_params=pltpu.CompilerParams(
            dimension_semantics=("arbitrary",)),
    )(*inputs)

    # torch: out.reshape(B, -1) on NCL layout
    out_ncl = jnp.transpose(out.reshape(B, L_last, C), (0, 2, 1))
    return out_ncl.reshape(B, C * L_last)


# ---------------------------------------------------------------------------
# Pure-JAX reference (mirrors the PyTorch forward) for a correctness check
# ---------------------------------------------------------------------------
def _ref_forward(x_ncl, params, kp):
    x = x_ncl.astype(jnp.float32)
    pools = ["avg", "avg", "max", "max"]
    for (w_kic, scale, shift), pool in zip(params, pools):
        K, cin, cout = w_kic.shape
        B, _, L = x.shape
        xp = jnp.pad(x, ((0, 0), (0, 0), (CONV_PAD, CONV_PAD)))
        L_conv = L + 2 * CONV_PAD - (K - 1)
        acc = jnp.zeros((B, cout, L_conv), jnp.float32)
        for k in range(K):
            acc = acc + jnp.einsum("bil,io->bol", xp[:, :, k:k + L_conv], w_kic[k])
        y = jnp.maximum(acc * scale.reshape(1, cout, 1) + shift.reshape(1, cout, 1), 0.0)
        if pool == "avg":
            out_dim = (L_conv + 1) // 2
            p = max(0, (out_dim - 1) * 2 + kp - L_conv)
            y = jnp.pad(y, ((0, 0), (0, 0), (p // 2, p - p // 2)), mode="reflect")
            y = jnp.stack([y[:, :, 2 * j:2 * j + kp].mean(-1) for j in range(out_dim)],
                          axis=-1)
        else:
            L_out = L_conv // 2
            y = y[:, :, :2 * L_out].reshape(B, cout, L_out, 2).max(-1)
        x = y
    return x.reshape(x.shape[0], -1)


# ---------------------------------------------------------------------------
if __name__ == "__main__":
    # training_params = {'data_dimensions': [4, 16], 'channel_n': 16, 'kernel_size': 2}
    B, input_channel, input_dim = 2, 4, 16
    channel_n = 16
    pool_kp = 2                      # training_params['kernel_size'] for the avg pools
    pools = ("avg", "avg", "max", "max")

    root = jax.random.PRNGKey(0)
    kx, k1, k2, k3, k4 = jax.random.split(root, 5)

    x = jax.random.normal(kx, (B, input_channel, input_dim), jnp.float32)

    layer_params = [
        init_layer_params(k1, input_channel, channel_n, KERNEL_SIZE1),
        init_layer_params(k2, channel_n, channel_n, KERNEL_SIZE1),
        init_layer_params(k3, channel_n, channel_n, KERNEL_SIZE1),
        init_layer_params(k4, channel_n, channel_n, KERNEL_SIZE1),
    ]
    pm_packed, avg_meta, Ls = build_avg_pool_matrices(B, input_dim, pool_kp, pools)
    w_packed, shift_packed = pack_params(layer_params, channel_n)

    out = jax.block_until_ready(
        feature_extractor_forward(x, w_packed, shift_packed, pm_packed,
                                  pools=pools, avg_meta=avg_meta))
    ref = jax.block_until_ready(_ref_forward(x, layer_params, pool_kp))

    # feature_out_dim = pool_layer4_dim * channel_n = 1 * 16
    assert out.shape == (B, Ls[-1] * channel_n), out.shape
    np.testing.assert_allclose(np.asarray(out), np.asarray(ref), atol=1e-4, rtol=1e-4)

    print("KERNEL_OK")
</pallas_src>

<mosaic_0001>
module attributes {stable_mosaic.version = 11 : i64} {
  func.func @kernel(%arg0: i32, %arg1: memref<40x16xf32, #tpu.memory_space<vmem>>, %arg2: memref<4x80x16xf32, #tpu.memory_space<vmem>>, %arg3: memref<4x16xf32, #tpu.memory_space<vmem>>, %arg4: memref<2x24x36xf32, #tpu.memory_space<vmem>>, %arg5: memref<2x16xf32, #tpu.memory_space<vmem>>, %arg6: memref<12x16xf32, #tpu.memory_space<vmem>>) attributes {dimension_semantics = [#tpu.dimension_semantics<arbitrary>], iteration_bounds = array<i64: 1>, scalar_prefetch = 0 : i64, scratch_operands = 1 : i64, tpu.core_type = #tpu.core_type<tc>, window_params = [{pipeline_mode = #tpu.pipeline_mode<synchronous>, transform_indices = @transform_0, window_bounds = array<i64: 40, 16>}, {pipeline_mode = #tpu.pipeline_mode<synchronous>, transform_indices = @transform_1, window_bounds = array<i64: 4, 80, 16>}, {pipeline_mode = #tpu.pipeline_mode<synchronous>, transform_indices = @transform_2, window_bounds = array<i64: 4, 16>}, {pipeline_mode = #tpu.pipeline_mode<synchronous>, transform_indices = @transform_3, window_bounds = array<i64: 2, 24, 36>}, {pipeline_mode = #tpu.pipeline_mode<synchronous>, transform_indices = @transform_4, window_bounds = array<i64: 2, 16>}]} {
    %c0 = arith.constant 0 : index
    %c0_0 = arith.constant 0 : index
    %0 = vector.load %arg1[%c0, %c0_0] : memref<40x16xf32, #tpu.memory_space<vmem>>, vector<40x16xf32>
    %1 = vector.extract_strided_slice %0 {offsets = [0, 0], sizes = [36, 16], strides = [1, 1]} : vector<40x16xf32> to vector<36x16xf32>
    %2 = vector.extract_strided_slice %0 {offsets = [1, 0], sizes = [36, 16], strides = [1, 1]} : vector<40x16xf32> to vector<36x16xf32>
    %3 = vector.extract_strided_slice %0 {offsets = [2, 0], sizes = [36, 16], strides = [1, 1]} : vector<40x16xf32> to vector<36x16xf32>
    %4 = vector.extract_strided_slice %0 {offsets = [3, 0], sizes = [36, 16], strides = [1, 1]} : vector<40x16xf32> to vector<36x16xf32>
    %5 = vector.extract_strided_slice %0 {offsets = [4, 0], sizes = [36, 16], strides = [1, 1]} : vector<40x16xf32> to vector<36x16xf32>
    %6 = tpu.concatenate %1, %2, %3, %4, %5 in 1 : vector<36x16xf32>, vector<36x16xf32>, vector<36x16xf32>, vector<36x16xf32>, vector<36x16xf32> -> vector<36x80xf32>
    %c0_1 = arith.constant 0 : index
    %c0_2 = arith.constant 0 : index
    %c0_3 = arith.constant 0 : index
    %7 = vector.load %arg2[%c0_1, %c0_2, %c0_3] : memref<4x80x16xf32, #tpu.memory_space<vmem>>, vector<1x80x16xf32>
    %8 = vector.shape_cast %7 : vector<1x80x16xf32> to vector<80x16xf32>
    %cst = arith.constant dense<0.000000e+00> : vector<36x16xf32>
    %9 = tpu.matmul %6, %8, %cst {dimension_numbers = #tpu.dot_dimension_numbers<[1], [0], [0], [1], [0, 0, 1, 1], [], []>} : vector<36x80xf32>, vector<80x16xf32>, vector<36x16xf32> -> vector<36x16xf32>
    %c0_4 = arith.constant 0 : index
    %c0_5 = arith.constant 0 : index
    %10 = vector.load %arg3[%c0_4, %c0_5] : memref<4x16xf32, #tpu.memory_space<vmem>>, vector<1x16xf32>
    %11 = vector.broadcast %10 : vector<1x16xf32> to vector<36x16xf32>
    %12 = arith.addf %9, %11 : vector<36x16xf32>
    %cst_6 = arith.constant 0.000000e+00 : f32
    %13 = vector.broadcast %cst_6 : f32 to vector<36x16xf32>
    %14 = arith.maximumf %12, %13 : vector<36x16xf32>
    %c0_7 = arith.constant 0 : index
    %c0_8 = arith.constant 0 : index
    %c0_9 = arith.constant 0 : index
    %15 = vector.load %arg4[%c0_7, %c0_8, %c0_9] : memref<2x24x36xf32, #tpu.memory_space<vmem>>, vector<1x24x36xf32>
    %16 = vector.shape_cast %15 : vector<1x24x36xf32> to vector<24x36xf32>
    %cst_10 = arith.constant dense<0.000000e+00> : vector<24x16xf32>
    %17 = tpu.matmul %16, %14, %cst_10 {dimension_numbers = #tpu.dot_dimension_numbers<[1], [0], [0], [1], [0, 0, 1, 1], [], []>} : vector<24x36xf32>, vector<36x16xf32>, vector<24x16xf32> -> vector<24x16xf32>
    %18 = vector.extract_strided_slice %17 {offsets = [0, 0], sizes = [20, 16], strides = [1, 1]} : vector<24x16xf32> to vector<20x16xf32>
    %19 = vector.extract_strided_slice %17 {offsets = [1, 0], sizes = [20, 16], strides = [1, 1]} : vector<24x16xf32> to vector<20x16xf32>
    %20 = vector.extract_strided_slice %17 {offsets = [2, 0], sizes = [20, 16], strides = [1, 1]} : vector<24x16xf32> to vector<20x16xf32>
    %21 = vector.extract_strided_slice %17 {offsets = [3, 0], sizes = [20, 16], strides = [1, 1]} : vector<24x16xf32> to vector<20x16xf32>
    %22 = vector.extract_strided_slice %17 {offsets = [4, 0], sizes = [20, 16], strides = [1, 1]} : vector<24x16xf32> to vector<20x16xf32>
    %23 = tpu.concatenate %18, %19, %20, %21, %22 in 1 : vector<20x16xf32>, vector<20x16xf32>, vector<20x16xf32>, vector<20x16xf32>, vector<20x16xf32> -> vector<20x80xf32>
    %c1 = arith.constant 1 : index
    %c0_11 = arith.constant 0 : index
    %c0_12 = arith.constant 0 : index
    %24 = vector.load %arg2[%c1, %c0_11, %c0_12] : memref<4x80x16xf32, #tpu.memory_space<vmem>>, vector<1x80x16xf32>
    %25 = vector.shape_cast %24 : vector<1x80x16xf32> to vector<80x16xf32>
    %cst_13 = arith.constant dense<0.000000e+00> : vector<20x16xf32>
    %26 = tpu.matmul %23, %25, %cst_13 {dimension_numbers = #tpu.dot_dimension_numbers<[1], [0], [0], [1], [0, 0, 1, 1], [], []>} : vector<20x80xf32>, vector<80x16xf32>, vector<20x16xf32> -> vector<20x16xf32>
    %c1_14 = arith.constant 1 : index
    %c0_15 = arith.constant 0 : index
    %27 = vector.load %arg3[%c1_14, %c0_15] : memref<4x16xf32, #tpu.memory_space<vmem>>, vector<1x16xf32>
    %28 = vector.broadcast %27 : vector<1x16xf32> to vector<20x16xf32>
    %29 = arith.addf %26, %28 : vector<20x16xf32>
    %cst_16 = arith.constant 0.000000e+00 : f32
    %30 = vector.broadcast %cst_16 : f32 to vector<20x16xf32>
    %31 = arith.maximumf %29, %30 : vector<20x16xf32>
    %c1_17 = arith.constant 1 : index
    %c0_18 = arith.constant 0 : index
    %c0_19 = arith.constant 0 : index
    %32 = vector.load %arg4[%c1_17, %c0_18, %c0_19] : memref<2x24x36xf32, #tpu.memory_space<vmem>>, vector<1x24x36xf32>
    %33 = vector.shape_cast %32 : vector<1x24x36xf32> to vector<24x36xf32>
    %34 = vector.extract_strided_slice %33 {offsets = [0, 0], sizes = [16, 20], strides = [1, 1]} : vector<24x36xf32> to vector<16x20xf32>
    %cst_20 = arith.constant dense<0.000000e+00> : vector<16x16xf32>
    %35 = tpu.matmul %34, %31, %cst_20 {dimension_numbers = #tpu.dot_dimension_numbers<[1], [0], [0], [1], [0, 0, 1, 1], [], []>} : vector<16x20xf32>, vector<20x16xf32>, vector<16x16xf32> -> vector<16x16xf32>
    %36 = vector.extract_strided_slice %35 {offsets = [0, 0], sizes = [12, 16], strides = [1, 1]} : vector<16x16xf32> to vector<12x16xf32>
    %37 = vector.extract_strided_slice %35 {offsets = [1, 0], sizes = [12, 16], strides = [1, 1]} : vector<16x16xf32> to vector<12x16xf32>
    %38 = vector.extract_strided_slice %35 {offsets = [2, 0], sizes = [12, 16], strides = [1, 1]} : vector<16x16xf32> to vector<12x16xf32>
    %39 = vector.extract_strided_slice %35 {offsets = [3, 0], sizes = [12, 16], strides = [1, 1]} : vector<16x16xf32> to vector<12x16xf32>
    %40 = vector.extract_strided_slice %35 {offsets = [4, 0], sizes = [12, 16], strides = [1, 1]} : vector<16x16xf32> to vector<12x16xf32>
    %41 = tpu.concatenate %36, %37, %38, %39, %40 in 1 : vector<12x16xf32>, vector<12x16xf32>, vector<12x16xf32>, vector<12x16xf32>, vector<12x16xf32> -> vector<12x80xf32>
    %c2 = arith.constant 2 : index
    %c0_21 = arith.constant 0 : index
    %c0_22 = arith.constant 0 : index
    %42 = vector.load %arg2[%c2, %c0_21, %c0_22] : memref<4x80x16xf32, #tpu.memory_space<vmem>>, vector<1x80x16xf32>
    %43 = vector.shape_cast %42 : vector<1x80x16xf32> to vector<80x16xf32>
    %cst_23 = arith.constant dense<0.000000e+00> : vector<12x16xf32>
    %44 = tpu.matmul %41, %43, %cst_23 {dimension_numbers = #tpu.dot_dimension_numbers<[1], [0], [0], [1], [0, 0, 1, 1], [], []>} : vector<12x80xf32>, vector<80x16xf32>, vector<12x16xf32> -> vector<12x16xf32>
    %c2_24 = arith.constant 2 : index
    %c0_25 = arith.constant 0 : index
    %45 = vector.load %arg3[%c2_24, %c0_25] : memref<4x16xf32, #tpu.memory_space<vmem>>, vector<1x16xf32>
    %46 = vector.broadcast %45 : vector<1x16xf32> to vector<12x16xf32>
    %47 = arith.addf %44, %46 : vector<12x16xf32>
    %cst_26 = arith.constant 0.000000e+00 : f32
    %48 = vector.broadcast %cst_26 : f32 to vector<12x16xf32>
    %49 = arith.maximumf %47, %48 : vector<12x16xf32>
    %50 = vector.extract_strided_slice %49 {offsets = [0, 0], sizes = [11, 16], strides = [1, 1]} : vector<12x16xf32> to vector<11x16xf32>
    %51 = vector.extract_strided_slice %49 {offsets = [1, 0], sizes = [11, 16], strides = [1, 1]} : vector<12x16xf32> to vector<11x16xf32>
    %52 = arith.maximumf %50, %51 : vector<11x16xf32>
    %cst_27 = arith.constant 0.000000e+00 : f32
    %53 = vector.broadcast %cst_27 : f32 to vector<12x16xf32>
    %c0_28 = arith.constant 0 : index
    %c0_29 = arith.constant 0 : index
    %54 = vector.load %arg6[%c0_28, %c0_29] : memref<12x16xf32, #tpu.memory_space<vmem>>, vector<12x16xf32>
    tpu.vector_store %arg6[%c0_28, %c0_29], %53 {strides = array<i32>} : memref<12x16xf32, #tpu.memory_space<vmem>>, vector<12x16xf32>,
    %55 = vector.extract_strided_slice %52 {offsets = [0, 0], sizes = [1, 16], strides = [1, 1]} : vector<11x16xf32> to vector<1x16xf32>
    %c2_30 = arith.constant 2 : index
    %c0_31 = arith.constant 0 : index
    %56 = vector.load %arg6[%c2_30, %c0_31] : memref<12x16xf32, #tpu.memory_space<vmem>>, vector<1x16xf32>
    tpu.vector_store %arg6[%c2_30, %c0_31], %55 {strides = array<i32>} : memref<12x16xf32, #tpu.memory_space<vmem>>, vector<1x16xf32>,
    %57 = vector.extract_strided_slice %52 {offsets = [2, 0], sizes = [1, 16], strides = [1, 1]} : vector<11x16xf32> to vector<1x16xf32>
    %c3 = arith.constant 3 : index
    %c0_32 = arith.constant 0 : index
    %58 = vector.load %arg6[%c3, %c0_32] : memref<12x16xf32, #tpu.memory_space<vmem>>, vector<1x16xf32>
    tpu.vector_store %arg6[%c3, %c0_32], %57 {strides = array<i32>} : memref<12x16xf32, #tpu.memory_space<vmem>>, vector<1x16xf32>,
    %59 = vector.extract_strided_slice %52 {offsets = [8, 0], sizes = [1, 16], strides = [1, 1]} : vector<11x16xf32> to vector<1x16xf32>
    %c8 = arith.constant 8 : index
    %c0_33 = arith.constant 0 : index
    %60 = vector.load %arg6[%c8, %c0_33] : memref<12x16xf32, #tpu.memory_space<vmem>>, vector<1x16xf32>
    tpu.vector_store %arg6[%c8, %c0_33], %59 {strides = array<i32>} : memref<12x16xf32, #tpu.memory_space<vmem>>, vector<1x16xf32>,
    %61 = vector.extract_strided_slice %52 {offsets = [10, 0], sizes = [1, 16], strides = [1, 1]} : vector<11x16xf32> to vector<1x16xf32>
    %c9 = arith.constant 9 : index
    %c0_34 = arith.constant 0 : index
    %62 = vector.load %arg6[%c9, %c0_34] : memref<12x16xf32, #tpu.memory_space<vmem>>, vector<1x16xf32>
    tpu.vector_store %arg6[%c9, %c0_34], %61 {strides = array<i32>} : memref<12x16xf32, #tpu.memory_space<vmem>>, vector<1x16xf32>,
    %c0_35 = arith.constant 0 : index
    %c0_36 = arith.constant 0 : index
    %63 = vector.load %arg6[%c0_35, %c0_36] : memref<12x16xf32, #tpu.memory_space<vmem>>, vector<12x16xf32>
    %64 = vector.extract_strided_slice %63 {offsets = [0, 0], sizes = [8, 16], strides = [1, 1]} : vector<12x16xf32> to vector<8x16xf32>
    %65 = vector.extract_strided_slice %63 {offsets = [1, 0], sizes = [8, 16], strides = [1, 1]} : vector<12x16xf32> to vector<8x16xf32>
    %66 = vector.extract_strided_slice %63 {offsets = [2, 0], sizes = [8, 16], strides = [1, 1]} : vector<12x16xf32> to vector<8x16xf32>
    %67 = vector.extract_strided_slice %63 {offsets = [3, 0], sizes = [8, 16], strides = [1, 1]} : vector<12x16xf32> to vector<8x16xf32>
    %68 = vector.extract_strided_slice %63 {offsets = [4, 0], sizes = [8, 16], strides = [1, 1]} : vector<12x16xf32> to vector<8x16xf32>
    %69 = tpu.concatenate %64, %65, %66, %67, %68 in 1 : vector<8x16xf32>, vector<8x16xf32>, vector<8x16xf32>, vector<8x16xf32>, vector<8x16xf32> -> vector<8x80xf32>
    %c3_37 = arith.constant 3 : index
    %c0_38 = arith.constant 0 : index
    %c0_39 = arith.constant 0 : index
    %70 = vector.load %arg2[%c3_37, %c0_38, %c0_39] : memref<4x80x16xf32, #tpu.memory_space<vmem>>, vector<1x80x16xf32>
    %71 = vector.shape_cast %70 : vector<1x80x16xf32> to vector<80x16xf32>
    %cst_40 = arith.constant dense<0.000000e+00> : vector<8x16xf32>
    %72 = tpu.matmul %69, %71, %cst_40 {dimension_numbers = #tpu.dot_dimension_numbers<[1], [0], [0], [1], [0, 0, 1, 1], [], []>} : vector<8x80xf32>, vector<80x16xf32>, vector<8x16xf32> -> vector<8x16xf32>
    %c3_41 = arith.constant 3 : index
    %c0_42 = arith.constant 0 : index
    %73 = vector.load %arg3[%c3_41, %c0_42] : memref<4x16xf32, #tpu.memory_space<vmem>>, vector<1x16xf32>
    %74 = vector.broadcast %73 : vector<1x16xf32> to vector<8x16xf32>
    %75 = arith.addf %72, %74 : vector<8x16xf32>
    %cst_43 = arith.constant 0.000000e+00 : f32
    %76 = vector.broadcast %cst_43 : f32 to vector<8x16xf32>
    %77 = arith.maximumf %75, %76 : vector<8x16xf32>
    %78 = vector.extract_strided_slice %77 {offsets = [0, 0], sizes = [7, 16], strides = [1, 1]} : vector<8x16xf32> to vector<7x16xf32>
    %79 = vector.extract_strided_slice %77 {offsets = [1, 0], sizes = [7, 16], strides = [1, 1]} : vector<8x16xf32> to vector<7x16xf32>
    %80 = arith.maximumf %78, %79 : vector<7x16xf32>
    %81 = vector.extract_strided_slice %80 {offsets = [0, 0], sizes = [1, 16], strides = [1, 1]} : vector<7x16xf32> to vector<1x16xf32>
    %c0_44 = arith.constant 0 : index
    %c0_45 = arith.constant 0 : index
    %82 = vector.load %arg5[%c0_44, %c0_45] : memref<2x16xf32, #tpu.memory_space<vmem>>, vector<1x16xf32>
    tpu.vector_store %arg5[%c0_44, %c0_45], %81 {strides = array<i32>} : memref<2x16xf32, #tpu.memory_space<vmem>>, vector<1x16xf32>,
    %83 = vector.extract_strided_slice %80 {offsets = [6, 0], sizes = [1, 16], strides = [1, 1]} : vector<7x16xf32> to vector<1x16xf32>
    %c1_46 = arith.constant 1 : index
    %c0_47 = arith.constant 0 : index
    %84 = vector.load %arg5[%c1_46, %c0_47] : memref<2x16xf32, #tpu.memory_space<vmem>>, vector<1x16xf32>
    tpu.vector_store %arg5[%c1_46, %c0_47], %83 {strides = array<i32>} : memref<2x16xf32, #tpu.memory_space<vmem>>, vector<1x16xf32>,
    return
  }
  func.func @transform_0(%arg0: i32) -> (i32, i32) {
    %c0_i32 = arith.constant 0 : i32
    %c0_i32_0 = arith.constant 0 : i32
    %c0_i32_1 = arith.constant 0 : i32
    return %c0_i32, %c0_i32_0 : i32, i32
  }
  func.func @transform_1(%arg0: i32) -> (i32, i32, i32) {
    %c0_i32 = arith.constant 0 : i32
    %c0_i32_0 = arith.constant 0 : i32
    %c0_i32_1 = arith.constant 0 : i32
    %c0_i32_2 = arith.constant 0 : i32
    return %c0_i32, %c0_i32_0, %c0_i32_1 : i32, i32, i32
  }
  func.func @transform_2(%arg0: i32) -> (i32, i32) {
    %c0_i32 = arith.constant 0 : i32
    %c0_i32_0 = arith.constant 0 : i32
    %c0_i32_1 = arith.constant 0 : i32
    return %c0_i32, %c0_i32_0 : i32, i32
  }
  func.func @transform_3(%arg0: i32) -> (i32, i32, i32) {
    %c0_i32 = arith.constant 0 : i32
    %c0_i32_0 = arith.constant 0 : i32
    %c0_i32_1 = arith.constant 0 : i32
    %c0_i32_2 = arith.constant 0 : i32
    return %c0_i32, %c0_i32_0, %c0_i32_1 : i32, i32, i32
  }
  func.func @transform_4(%arg0: i32) -> (i32, i32) {
    %c0_i32 = arith.constant 0 : i32
    %c0_i32_0 = arith.constant 0 : i32
    %c0_i32_1 = arith.constant 0 : i32
    return %c0_i32, %c0_i32_0 : i32, i32
  }
}

</mosaic_0001>

<bundles_post_ra>
// kernel: feature_extractor_forward.1
= control target key start
LH: loop header
LB: loop body
LE: loop exit
PB: predicated region body
PF: predicated region fallthrough
CT: control target
= control target key end

     0   :  { %vm28_vm0 = vcmask 1046528   ;;  %vm78_vm1 = vcmask 1044480   ;;  %vm53_vm2 = vcmask 1045504   ;;  %vm103_vm3 = vcmask 1043456   ;;  %s1310_s21 = smov 16   ;;  %s1311_s22 = smov 48   ;;  %s1737_s0 = inlined_call_operand.vmem [shape: f32[40,16], index: 0, kind: input, shape index: {}]   ;;  %s1738_s1 = inlined_call_operand.vmem [shape: f32[4,80,16], index: 1, kind: input, shape index: {}]   ;;  %s1739_s2 = inlined_call_operand.vmem [shape: f32[4,16], index: 2, kind: input, shape index: {}]   ;;  %s1740_s3 = inlined_call_operand.vmem [shape: f32[2,24,36], index: 3, kind: input, shape index: {}]   ;;  %s1741_s4 = inlined_call_operand.hbm [shape: f32[2,16], index: 4, kind: output, shape index: {}]  }
   0x1   :  { %v1346_v0 = vld [vmem:[%s1737_s0] sm:$0xff]  ;;  %v1351_v1 = vld [vmem:[%s1737_s0 + $0x8] sm:$0xff]  ;;  %v1362_v8 = vld [vmem:[%s1737_s0 + $0x10] sm:$0xff] }
   0x2   :  { %v29_v2 = vrot.slane %v1346_v0, 1  ;;  %v30_v3 = vrot.slane %v1351_v1, 1  ;;  %v79_v4 = vrot.slane %v1346_v0, 3  ;;  %v80_v5 = vrot.slane %v1351_v1, 3  ;;  %v152_v17 = vld [vmem:[%s1738_s1] sm:$0xff]  ;;  %v153_v18 = vld [vmem:[%s1738_s1 + $0x8] sm:$0xff] }
   0x3   :  { %v54_v6 = vrot.slane %v1346_v0, 2  ;;  %v55_v7 = vrot.slane %v1351_v1, 2  ;;  %v104_v11 = vrot.slane %v1346_v0, 4  ;;  %v105_v12 = vrot.slane %v1351_v1, 4 }
   0x4   :  { %v31_v9 = vsel %vm28_vm0, %v29_v2, %v30_v3  ;;  %v81_v10 = vsel %vm78_vm1, %v79_v4, %v80_v5  ;;  %v32_v15 = vrot.slane %v1362_v8, 1  ;;  %v57_v16 = vrot.slane %v1362_v8, 2 }
   0x5   :  { %38 = vrot.lane.b32.xlu0 %v31_v9, %s1310_s21  ;;  %88 = vrot.lane.b32.xlu1 %v81_v10, %s1311_s22  ;;  %v56_v13 = vsel %vm53_vm2, %v54_v6, %v55_v7  ;;  %v106_v14 = vsel %vm103_vm3, %v104_v11, %v105_v12 }
   0x6   :  { %9 = vsyncpa [#allocation4], 0  ;;  %s1312_s27 = smov 32   ;;  %s1313_s28 = smov 64   ;;  %v82_v19 = vrot.slane %v1362_v8, 3  ;;  %v107_v20 = vrot.slane %v1362_v8, 4  ;;  %v33_v23 = vsel %vm28_vm0, %v30_v3, %v32_v15  ;;  %v58_v24 = vsel %vm53_vm2, %v55_v7, %v57_v16 }
   0x7   :  { %v154_v21 = vld [vmem:[%s1738_s1 + $0x10] sm:$0xff]  ;;  %v155_v22 = vld [vmem:[%s1738_s1 + $0x18] sm:$0xff]  ;;  %v1204_v26 = vpack.c.bf16 %v153_v18, %v152_v17  ;;  %v1314_v27 = vmov 0.0|0.0   ;;  %v156_v32 = vld [vmem:[%s1738_s1 + $0x20] sm:$0xff]  ;;  %vm128_vm4 = vcmask 130048   ;;  %vm1315_vm5 = vmmov 0  }
   0x8   :  { %v1395_v25 = vld [vmem:[%s1737_s0 + $0x18] sm:$0xff]  ;;  %1203 = vmatprep.subr.bf16.mxu0 %v1314_v27  ;;  %v1207_v28 = vpack.c.bf16 %v155_v22, %v154_v21  ;;  %1218 = vmatprep.subr.bf16.mxu1 %v1314_v27  ;;  %v83_v29 = vsel %vm78_vm1, %v80_v5, %v82_v19  ;;  %v157_v33 = vld [vmem:[%s1738_s1 + $0x28] sm:$0xff]  ;;  %v108_v34 = vsel %vm103_vm3, %v105_v12, %v107_v20  ;;  %v1316_v35 = vmov 0.0   ;;  %v158_v37 = vld [vmem:[%s1738_s1 + $0x30] sm:$0xff] }
   0x9   :  { %63 = vrot.lane.b32.xlu0 %v56_v13, %s1312_s27  ;;  %113 = vrot.lane.b32.xlu1 %v106_v14, %s1313_s28  ;;  %v34_v30 = vrot.slane %v1395_v25, 1  ;;  %v59_v31 = vrot.slane %v1395_v25, 2  ;;  %795 = vst.msk [vmem:[#allocation2] sm:$0xff] %vm128_vm4, %v1316_v35  ;;  %v1210_v36 = vpack.c.bf16 %v157_v33, %v156_v32  ;;  %v159_v38 = vld [vmem:[%s1738_s1 + $0x38] sm:$0xff]  ;;  %v84_v41 = vrot.slane %v1395_v25, 3  ;;  %v1434_v43 = vld [vmem:[%s1737_s0 + $0x20] sm:$0xff] }
   0xa   :  { %1205 = vmatpush3.bf16.msra.mxu0 %v1204_v26  ;;  %1085 = vmatprep.mubr.msk.f32.mxu0 %vm1315_vm5, %v1316_v35  ;;  %v109_v42 = vrot.slane %v1395_v25, 4  ;;  %v1213_v44 = vpack.c.bf16 %v159_v38, %v158_v37  ;;  %v160_v45 = vld [vmem:[%s1738_s1 + $0x40] sm:$0xff]  ;;  %v161_v46 = vld [vmem:[%s1738_s1 + $0x48] sm:$0xff]  ;;  %v36_v49 = vrot.slane %v1434_v43, 1  ;;  %v61_v50 = vrot.slane %v1434_v43, 2 }
   0xb   :  { %1206 = vmatprep.subr.bf16.mxu0 %v1314_v27  ;;  %1110 = vmatprep.mubr.msk.f32.mxu1 %vm1315_vm5, %v1316_v35  ;;  %v35_v39 = vsel %vm28_vm0, %v32_v15, %v34_v30  ;;  %v60_v40 = vsel %vm53_vm2, %v57_v16, %v59_v31  ;;  %v85_v47 = vsel %vm78_vm1, %v82_v19, %v84_v41  ;;  %v86_v54 = vrot.slane %v1434_v43, 3  ;;  %v947_v38 = vld [vmem:[%s1739_s2] ss:$0 sm:$0xff] }
   0xc   :  { %v110_v48 = vsel %vm103_vm3, %v107_v20, %v109_v42  ;;  %v1216_v51 = vpack.c.bf16 %v161_v46, %v160_v45  ;;  %v37_v52 = vsel %vm28_vm0, %v34_v30, %v36_v49  ;;  %v62_v53 = vsel %vm53_vm2, %v59_v31, %v61_v50 }
   0xd   :  { %40 = vrot.lane.b32.xlu0 %v33_v23, %s1310_s21  ;;  %65 = vrot.lane.b32.xlu1 %v58_v24, %s1312_s27  ;;  %v111_v55 = vrot.slane %v1434_v43, 4  ;;  %v87_v56 = vsel %vm78_vm1, %v84_v41, %v86_v54  ;;  %vm134_vm6 = vcmask 261120   ;;  %vm140_vm7 = vcmask 392192  }
   0xe   :  { %1208 = vmatpush3.bf16.msra.mxu0 %v1207_v28  ;;  %vm146_vm8 = vcmask 523264   ;;  %vm167_vm9 = vcmask 654336   ;;  %vm281_vm10 = vcmask 293888   ;;  %vm556_vm11 = vcmask 162816  }
   0xf   :  { %1209 = vmatprep.subr.bf16.mxu0 %v1314_v27  ;;  %v112_v57 = vsel %vm103_vm3, %v109_v42, %v111_v55  ;;  %vm796_vm12 = vcmask 125952   ;;  %vm798_vm13 = vcmask 122880   ;;  %vm800_vm14 = vcmask 124930  }
  0x10   :  { %797 = vst.msk [vmem:[#allocation2 + $0x8] sm:$0xf] %vm796_vm12, %v1316_v35  ;;  %vm931_vm15 = vcmask 129030  }
  0x11   :  { %90 = vrot.lane.b32.xlu0 %v83_v29, %s1311_s22  ;;  %115 = vrot.lane.b32.xlu1 %v108_v34, %s1313_s28 }
  0x12   :  { %1211 = vmatpush3.bf16.msra.mxu0 %v1210_v36 }
  0x13   :  { %1212 = vmatprep.subr.bf16.mxu0 %v1314_v27 }
  0x15   :  { %42 = vrot.lane.b32.xlu0 %v35_v39, %s1310_s21  ;;  %67 = vrot.lane.b32.xlu1 %v60_v40, %s1312_s27 }
  0x16   :  { %1214 = vmatpush3.bf16.msra.mxu0 %v1213_v44 }
  0x17   :  { %1215 = vmatprep.subr.bf16.mxu0 %v1314_v27 }
  0x19   :  { %92 = vrot.lane.b32.xlu0 %v85_v47, %s1311_s22  ;;  %117 = vrot.lane.b32.xlu1 %v110_v48, %s1313_s28 }
  0x1a   :  { %1217 = vmatpush3.bf16.msra.mxu0 %v1216_v51 }
  0x1d   :  { %44 = vrot.lane.b32.xlu0 %v37_v52, %s1310_s21  ;;  %69 = vrot.lane.b32.xlu1 %v62_v53, %s1312_s27 }
  0x21   :  { %94 = vrot.lane.b32.xlu0 %v87_v56, %s1311_s22  ;;  %119 = vrot.lane.b32.xlu1 %v112_v57, %s1313_s28 }
  0x25   :  { %46 = vrot.lane.b32.xlu0 %v36_v49, %s1310_s21  ;;  %71 = vrot.lane.b32.xlu1 %v61_v50, %s1312_s27 }
  0x29   :  { %96 = vrot.lane.b32.xlu0 %v86_v54, %s1311_s22  ;;  %121 = vrot.lane.b32.xlu1 %v111_v55, %s1313_s28 }
  0x77   :  { %v39_v58 = vpop.permute.xlu0 %38  ;;  %v89_v59 = vpop.permute.xlu1 %88 }
  0x78   :  { %v129_v60 = vsel %vm128_vm4, %v1346_v0, %v39_v58 }
  0x7b   :  { %v64_v61 = vpop.permute.xlu0 %63  ;;  %v114_v62 = vpop.permute.xlu1 %113 }
  0x7c   :  { %v135_v63 = vsel %vm134_vm6, %v129_v60, %v64_v61  ;;  %v279_v60 = vld [vmem:[%s1740_s3 + $0x8] sm:$0xff]  ;;  %v280_v61 = vld [vmem:[%s1740_s3 + $0x10] sm:$0xff] }
  0x7d   :  { %v141_v2 = vsel %vm140_vm7, %v135_v63, %v89_v59  ;;  %v278_v59 = vld [vmem:[%s1740_s3] sm:$0xff]  ;;  %v958_v63 = vld [vmem:[%s1738_s1 + $0x58] sm:$0xff] }
  0x7e   :  { %v147_v3 = vsel %vm146_vm8, %v141_v2, %v114_v62  ;;  %v957_v62 = vld [vmem:[%s1738_s1 + $0x50] sm:$0xff]  ;;  %v959_v2 = vld [vmem:[%s1738_s1 + $0x60] sm:$0xff] }
  0x7f   :  { %1086 = vmatmul.mubr.msk.f32.vlgmr.msra.gmra.mrb[0].mxu0 %vm167_vm9, %v147_v3  ;;  %v41_v4 = vpop.permute.xlu0 %40  ;;  %v66_v5 = vpop.permute.xlu1 %65  ;;  %v1225_v3 = vpack.c.bf16 %v958_v63, %v957_v62 }
  0x80   :  { %v130_v6 = vsel %vm128_vm4, %v1351_v1, %v41_v4  ;;  %1088 = vmatprep.mubr.msk.f32.mxu0 %vm1315_vm5, %v1316_v35  ;;  %v960_v4 = vld [vmem:[%s1738_s1 + $0x68] sm:$0xff] }
  0x81   :  { %v136_v0 = vsel %vm134_vm6, %v130_v6, %v66_v5  ;;  %v1228_v5 = vpack.c.bf16 %v960_v4, %v959_v2  ;;  %v961_v6 = vld [vmem:[%s1738_s1 + $0x70] sm:$0xff] }
  0x83   :  { %v91_v7 = vpop.permute.xlu0 %90  ;;  %v116_v9 = vpop.permute.xlu1 %115 }
  0x84   :  { %v142_v10 = vsel %vm140_vm7, %v136_v0, %v91_v7  ;;  %v962_v0 = vld [vmem:[%s1738_s1 + $0x78] sm:$0xff] }
  0x85   :  { %v148_v11 = vsel %vm146_vm8, %v142_v10, %v116_v9  ;;  %v1231_v7 = vpack.c.bf16 %v962_v0, %v961_v6  ;;  %v963_v9 = vld [vmem:[%s1738_s1 + $0x80] sm:$0xff]  ;;  %v964_v10 = vld [vmem:[%s1738_s1 + $0x88] sm:$0xff] }
  0x86   :  { %1089 = vmatmul.mubr.msk.f32.gmra.mrb[2].mxu0 %vm167_vm9, %v148_v11  ;;  %v1234_v11 = vpack.c.bf16 %v964_v10, %v963_v9  ;;  %v967_v6 = vld [vmem:[%s1739_s2 + $0x1] ss:$0 sm:$0xff] }
  0x87   :  { %v43_v12 = vpop.permute.xlu0 %42  ;;  %v68_v13 = vpop.permute.xlu1 %67  ;;  %1091 = vmatprep.mubr.msk.f32.mxu0 %vm1315_vm5, %v1316_v35 }
  0x88   :  { %v131_v1 = vsel %vm128_vm4, %v1362_v8, %v43_v12  ;;  %v965_v12 = vld [vmem:[%s1738_s1 + $0x90] sm:$0xff] }
  0x89   :  { %v137_v14 = vsel %vm134_vm6, %v131_v1, %v68_v13  ;;  %v966_v13 = vld [vmem:[%s1738_s1 + $0x98] sm:$0xff] }
  0x8a   :  { %v1237_v1 = vpack.c.bf16 %v966_v13, %v965_v12 }
  0x8b   :  { %v93_v15 = vpop.permute.xlu0 %92  ;;  %v118_v16 = vpop.permute.xlu1 %117 }
  0x8c   :  { %v143_v17 = vsel %vm140_vm7, %v137_v14, %v93_v15 }
  0x8d   :  { %v149_v18 = vsel %vm146_vm8, %v143_v17, %v118_v16 }
  0x8e   :  { %1092 = vmatmul.mubr.msk.f32.gmra.mrb[4].mxu0 %vm167_vm9, %v149_v18 }
  0x8f   :  { %v45_v19 = vpop.permute.xlu0 %44  ;;  %v70_v20 = vpop.permute.xlu1 %69  ;;  %1094 = vmatprep.mubr.msk.f32.mxu0 %vm1315_vm5, %v1316_v35 }
  0x90   :  { %v132_v21 = vsel %vm128_vm4, %v1395_v25, %v45_v19 }
  0x91   :  { %v138_v8 = vsel %vm134_vm6, %v132_v21, %v70_v20 }
  0x93   :  { %v95_v22 = vpop.permute.xlu0 %94  ;;  %v120_v23 = vpop.permute.xlu1 %119 }
  0x94   :  { %v144_v24 = vsel %vm140_vm7, %v138_v8, %v95_v22 }
  0x95   :  { %v150_v26 = vsel %vm146_vm8, %v144_v24, %v120_v23 }
  0x96   :  { %1095 = vmatmul.mubr.msk.f32.gmra.mrb[6].mxu0 %vm167_vm9, %v150_v26 }
  0x97   :  { %v47_v28 = vpop.permute.xlu0 %46  ;;  %v72_v29 = vpop.permute.xlu1 %71  ;;  %1097 = vmatprep.mubr.msk.f32.mxu0 %vm1315_vm5, %v1316_v35 }
  0x98   :  { %v133_v30 = vsel %vm128_vm4, %v1434_v43, %v47_v28 }
  0x99   :  { %v139_v25 = vsel %vm134_vm6, %v133_v30, %v72_v29 }
  0x9b   :  { %v97_v31 = vpop.permute.xlu0 %96  ;;  %v122_v32 = vpop.permute.xlu1 %121 }
  0x9c   :  { %v145_v33 = vsel %vm140_vm7, %v139_v25, %v97_v31 }
  0x9d   :  { %v151_v34 = vsel %vm146_vm8, %v145_v33, %v122_v32 }
  0x9e   :  { %1098 = vmatmul.mubr.msk.f32.gmra.mrb[8].mxu0 %vm167_vm9, %v151_v34 }
 0x152   :  { %v249_v36 = vpop.f32.mrb[0].mxu0 }
 0x153   :  { %v1087_v37 = vpop.f32.mrb[1].mxu0  ;;  %v250_v39 = vadd.f32 %v947_v38, %v249_v36 }
 0x155   :  { %v273_v43 = vmax.f32 %v250_v39, 0.0 }
 0x159   :  { %v254_v40 = vpop.f32.mrb[2].mxu0 }
 0x15a   :  { %v255_v41 = vadd.f32 %v947_v38, %v254_v40  ;;  %v1090_v42 = vpop.f32.mrb[3].mxu0 }
 0x15c   :  { %v274_v44 = vmax.f32 %v255_v41, 0.0 }
 0x15e   :  { %v1219_v45 = vpack.c.bf16 %v274_v44, %v273_v43 }
 0x160   :  { %1220 = vmatpush3.bf16.msra.mxu1 %v1219_v45 }
 0x161   :  { %v259_v46 = vpop.f32.mrb[4].mxu0  ;;  %1221 = vmatprep.subr.bf16.mxu1 %v1314_v27 }
 0x162   :  { %v1093_v47 = vpop.f32.mrb[5].mxu0  ;;  %v260_v48 = vadd.f32 %v947_v38, %v259_v46 }
 0x164   :  { %v275_v52 = vmax.f32 %v260_v48, 0.0 }
 0x169   :  { %v264_v49 = vpop.f32.mrb[6].mxu0 }
 0x16a   :  { %v265_v50 = vadd.f32 %v947_v38, %v264_v49  ;;  %v1096_v51 = vpop.f32.mrb[7].mxu0 }
 0x16c   :  { %v276_v53 = vmax.f32 %v265_v50, 0.0 }
 0x16e   :  { %v1222_v54 = vpack.c.bf16 %v276_v53, %v275_v52 }
 0x170   :  { %1223 = vmatpush3.bf16.msra.mxu1 %v1222_v54 }
 0x171   :  { %v269_v55 = vpop.f32.mrb[8].mxu0  ;;  %1108 = vmatprep.subr.mxu1 %v1316_v35 }
 0x172   :  { %v270_v56 = vadd.f32 %v947_v38, %v269_v55  ;;  %v1099_v57 = vpop.f32.mrb[9].mxu0 }
 0x174   :  { %v277_v58 = vmax.f32 %v270_v56, 0.0 }
 0x176   :  { %1109 = vmatpush3.msk.msra.mxu1 %vm103_vm3, %v277_v58 }
 0x177   :  { %1111 = vmatmul.mubr.msk.f32.vlgmr.msra.gmra.mrb[0].mxu1 %vm281_vm10, %v278_v59  ;;  %1224 = vmatprep.subr.bf16.mxu1 %v1314_v27 }
 0x178   :  { %1113 = vmatprep.mubr.msk.f32.mxu1 %vm1315_vm5, %v1316_v35  ;;  %1226 = vmatpush3.bf16.msra.mxu1 %v1225_v3  ;;  %v971_v3 = vld [vmem:[%s1740_s3 + $0x18] sm:$0xff] }
 0x179   :  { %1227 = vmatprep.subr.bf16.mxu1 %v1314_v27  ;;  %1154 = vmatprep.mubr.msk.f32.mxu0 %vm556_vm11, %v971_v3  ;;  %v990_v3 = vld [vmem:[%s1738_s1 + $0xf8] sm:$0xff] }
 0x17b   :  { %1114 = vmatmul.mubr.msk.f32.gmra.mrb[2].mxu1 %vm281_vm10, %v279_v60 }
 0x17c   :  { %1116 = vmatprep.mubr.msk.f32.mxu1 %vm1315_vm5, %v1316_v35  ;;  %1229 = vmatpush3.bf16.msra.mxu1 %v1228_v5 }
 0x17d   :  { %1230 = vmatprep.subr.bf16.mxu1 %v1314_v27 }
 0x17f   :  { %1117 = vmatmul.mubr.msk.f32.gmra.mrb[4].mxu1 %vm281_vm10, %v280_v61 }
 0x180   :  { %1139 = vmatprep.mubr.msk.f32.mxu1 %vm1315_vm5, %v1316_v35  ;;  %1232 = vmatpush3.bf16.msra.mxu1 %v1231_v7 }
 0x181   :  { %1233 = vmatprep.subr.bf16.mxu1 %v1314_v27 }
 0x184   :  { %1235 = vmatpush3.bf16.msra.mxu1 %v1234_v11 }
 0x185   :  { %1236 = vmatprep.subr.bf16.mxu1 %v1314_v27 }
 0x188   :  { %1238 = vmatpush3.bf16.msra.mxu1 %v1237_v1 }
 0x24a   :  { %v360_v14 = vpop.f32.mrb[0].mxu1 }
 0x24b   :  { %v1112_v15 = vpop.f32.mrb[1].mxu1  ;;  %v391_v17 = vrot.slane %v360_v14, 2  ;;  %v377_v18 = vrot.slane %v360_v14, 1  ;;  %v419_v19 = vrot.slane %v360_v14, 4  ;;  %v405_v20 = vrot.slane %v360_v14, 3 }
 0x24e   :  { %v365_v16 = vpop.f32.mrb[2].mxu1 }
 0x24f   :  { %v1115_v21 = vpop.f32.mrb[3].mxu1  ;;  %v392_v8 = vrot.slane %v365_v16, 2  ;;  %v378_v22 = vrot.slane %v365_v16, 1  ;;  %v420_v23 = vrot.slane %v365_v16, 4  ;;  %v406_v24 = vrot.slane %v365_v16, 3 }
 0x250   :  { %v978_v21 = vld [vmem:[%s1738_s1 + $0xb0] sm:$0xff] }
 0x251   :  { %v393_v26 = vsel %vm53_vm2, %v391_v17, %v392_v8  ;;  %v379_v28 = vsel %vm28_vm0, %v377_v18, %v378_v22  ;;  %v421_v29 = vsel %vm103_vm3, %v419_v19, %v420_v23  ;;  %v407_v30 = vsel %vm78_vm1, %v405_v20, %v406_v24  ;;  %v972_v17 = vld [vmem:[%s1740_s3 + $0x20] sm:$0xff]  ;;  %v977_v19 = vld [vmem:[%s1738_s1 + $0xa8] sm:$0xff] }
 0x252   :  { %396 = vrot.lane.b32.xlu1 %v393_v26, %s1312_s27  ;;  %382 = vrot.lane.b32.xlu0 %v379_v28, %s1310_s21  ;;  %v370_v25 = vpop.f32.mrb[4].mxu1  ;;  %v976_v18 = vld [vmem:[%s1738_s1 + $0xa0] sm:$0xff]  ;;  %v982_v28 = vld [vmem:[%s1738_s1 + $0xd0] sm:$0xff] }
 0x253   :  { %v1118_v31 = vpop.f32.mrb[5].mxu1  ;;  %v394_v32 = vrot.slane %v370_v25, 2  ;;  %v380_v33 = vrot.slane %v370_v25, 1  ;;  %v422_v34 = vrot.slane %v370_v25, 4  ;;  %v408_v36 = vrot.slane %v370_v25, 3 }
 0x254   :  { %v1243_v20 = vpack.c.bf16 %v977_v19, %v976_v18  ;;  %v985_v31 = vld [vmem:[%s1738_s1 + $0xe8] sm:$0xff] }
 0x255   :  { %v395_v37 = vsel %vm53_vm2, %v392_v8, %v394_v32  ;;  %v381_v38 = vsel %vm28_vm0, %v378_v22, %v380_v33  ;;  %v423_v39 = vsel %vm103_vm3, %v420_v23, %v422_v34  ;;  %v409_v40 = vsel %vm78_vm1, %v406_v24, %v408_v36  ;;  %v979_v8 = vld [vmem:[%s1738_s1 + $0xb8] sm:$0xff]  ;;  %v980_v23 = vld [vmem:[%s1738_s1 + $0xc0] sm:$0xff]  ;;  %v981_v24 = vld [vmem:[%s1738_s1 + $0xc8] sm:$0xff] }
 0x256   :  { %424 = vrot.lane.b32.xlu1 %v421_v29, %s1313_s28  ;;  %410 = vrot.lane.b32.xlu0 %v407_v30, %s1311_s22  ;;  %v1247_v22 = vpack.c.bf16 %v979_v8, %v978_v21  ;;  %v1251_v26 = vpack.c.bf16 %v981_v24, %v980_v23  ;;  %v983_v29 = vld [vmem:[%s1738_s1 + $0xd8] sm:$0xff] }
 0x257   :  { %1244 = vmatprep.subr.bf16.mxu1 %v1243_v20  ;;  %v1255_v30 = vpack.c.bf16 %v983_v29, %v982_v28  ;;  %v998_v23 = vld [vmem:[%s1738_s1 + $0x138] sm:$0xff] }
 0x25a   :  { %398 = vrot.lane.b32.xlu1 %v395_v37, %s1312_s27  ;;  %384 = vrot.lane.b32.xlu0 %v381_v38, %s1310_s21 }
 0x25e   :  { %426 = vrot.lane.b32.xlu1 %v423_v39, %s1313_s28  ;;  %412 = vrot.lane.b32.xlu0 %v409_v40, %s1311_s22 }
 0x262   :  { %400 = vrot.lane.b32.xlu1 %v394_v32, %s1312_s27  ;;  %386 = vrot.lane.b32.xlu0 %v380_v33, %s1310_s21 }
 0x266   :  { %428 = vrot.lane.b32.xlu1 %v422_v34, %s1313_s28  ;;  %414 = vrot.lane.b32.xlu0 %v408_v36, %s1311_s22 }
 0x2c4   :  { %v397_v41 = vpop.permute.xlu1 %396  ;;  %v383_v42 = vpop.permute.xlu0 %382 }
 0x2c5   :  { %v433_v43 = vsel %vm128_vm4, %v360_v14, %v383_v42 }
 0x2c6   :  { %v436_v45 = vsel %vm134_vm6, %v433_v43, %v397_v41 }
 0x2c8   :  { %v425_v44 = vpop.permute.xlu1 %424  ;;  %v411_v46 = vpop.permute.xlu0 %410 }
 0x2c9   :  { %v439_v47 = vsel %vm140_vm7, %v436_v45, %v411_v46 }
 0x2ca   :  { %v442_v48 = vsel %vm146_vm8, %v439_v47, %v425_v44 }
 0x2cb   :  { %1140 = vmatmul.mubr.msk.f32.vlgmr.msra.gmra.mrb[6].mxu1 %vm167_vm9, %v442_v48 }
 0x2cc   :  { %v399_v49 = vpop.permute.xlu1 %398  ;;  %v385_v50 = vpop.permute.xlu0 %384  ;;  %1142 = vmatprep.mubr.msk.f32.mxu1 %vm1315_vm5, %v1316_v35  ;;  %1246 = vmatpush3.bf16.msra.mxu1 %v1243_v20 }
 0x2cd   :  { %v434_v51 = vsel %vm128_vm4, %v365_v16, %v385_v50  ;;  %1248 = vmatprep.subr.bf16.mxu1 %v1247_v22 }
 0x2ce   :  { %v437_v53 = vsel %vm134_vm6, %v434_v51, %v399_v49 }
 0x2d0   :  { %v427_v52 = vpop.permute.xlu1 %426  ;;  %v413_v54 = vpop.permute.xlu0 %412  ;;  %1250 = vmatpush3.bf16.msra.mxu1 %v1247_v22  ;;  %v997_v22 = vld [vmem:[%s1738_s1 + $0x130] sm:$0xff] }
 0x2d1   :  { %v440_v55 = vsel %vm140_vm7, %v437_v53, %v413_v54  ;;  %1252 = vmatprep.subr.bf16.mxu1 %v1251_v26  ;;  %v1276_v24 = vpack.c.bf16 %v998_v23, %v997_v22 }
 0x2d2   :  { %v443_v56 = vsel %vm146_vm8, %v440_v55, %v427_v52 }
 0x2d3   :  { %1143 = vmatmul.mubr.msk.f32.gmra.mrb[8].mxu1 %vm167_vm9, %v443_v56 }
 0x2d4   :  { %v401_v57 = vpop.permute.xlu1 %400  ;;  %v387_v58 = vpop.permute.xlu0 %386  ;;  %1145 = vmatprep.mubr.msk.f32.mxu1 %vm1315_vm5, %v1316_v35  ;;  %1254 = vmatpush3.bf16.msra.mxu1 %v1251_v26 }
 0x2d5   :  { %v435_v59 = vsel %vm128_vm4, %v370_v25, %v387_v58  ;;  %1256 = vmatprep.subr.bf16.mxu1 %v1255_v30  ;;  %v984_v25 = vld [vmem:[%s1738_s1 + $0xe0] sm:$0xff] }
 0x2d6   :  { %v438_v61 = vsel %vm134_vm6, %v435_v59, %v401_v57  ;;  %v1259_v33 = vpack.c.bf16 %v985_v31, %v984_v25 }
 0x2d8   :  { %v429_v60 = vpop.permute.xlu1 %428  ;;  %v415_v62 = vpop.permute.xlu0 %414  ;;  %1258 = vmatpush3.bf16.msra.mxu1 %v1255_v30 }
 0x2d9   :  { %v441_v63 = vsel %vm140_vm7, %v438_v61, %v415_v62  ;;  %1260 = vmatprep.subr.bf16.mxu1 %v1259_v33 }
 0x2da   :  { %v444_v2 = vsel %vm146_vm8, %v441_v63, %v429_v60 }
 0x2db   :  { %1146 = vmatmul.mubr.msk.f32.gmra.mrb[10].mxu1 %vm167_vm9, %v444_v2  ;;  %v989_v2 = vld [vmem:[%s1738_s1 + $0xf0] sm:$0xff] }
 0x2dc   :  { %1262 = vmatpush3.bf16.msra.mxu1 %v1259_v33 }
 0x39e   :  { %v536_v4 = vpop.f32.mrb[6].mxu1 }
 0x39f   :  { %v1141_v5 = vpop.f32.mrb[7].mxu1  ;;  %v537_v0 = vadd.f32 %v967_v6, %v536_v4  ;;  %v991_v4 = vld [vmem:[%s1738_s1 + $0x100] sm:$0xff] }
 0x3a0   :  { %v1264_v5 = vpack.c.bf16 %v990_v3, %v989_v2 }
 0x3a1   :  { %v550_v11 = vmax.f32 %v537_v0, 0.0 }
 0x3a6   :  { %v541_v7 = vpop.f32.mrb[8].mxu1 }
 0x3a7   :  { %v542_v9 = vadd.f32 %v967_v6, %v541_v7  ;;  %v1144_v10 = vpop.f32.mrb[9].mxu1  ;;  %v994_v7 = vld [vmem:[%s1738_s1 + $0x118] sm:$0xff] }
 0x3a8   :  { %v995_v10 = vld [vmem:[%s1738_s1 + $0x120] sm:$0xff] }
 0x3a9   :  { %v551_v12 = vmax.f32 %v542_v9, 0.0 }
 0x3ab   :  { %v1239_v13 = vpack.c.bf16 %v551_v12, %v550_v11  ;;  %v996_v11 = vld [vmem:[%s1738_s1 + $0x128] sm:$0xff] }
 0x3ac   :  { %v1273_v12 = vpack.c.bf16 %v996_v11, %v995_v10 }
 0x3ad   :  { %1240 = vmatprep.subr.bf16.mxu0 %v1239_v13 }
 0x3ae   :  { %v546_v1 = vpop.f32.mrb[10].mxu1  ;;  %1242 = vmatpush3.bf16.msra.mxu0 %v1239_v13  ;;  %v986_v13 = vld [vmem:[%s1739_s2 + $0x2] ss:$0 sm:$0xff] }
 0x3af   :  { %v547_v14 = vadd.f32 %v967_v6, %v546_v1  ;;  %v1147_v15 = vpop.f32.mrb[11].mxu1  ;;  %v992_v6 = vld [vmem:[%s1738_s1 + $0x108] sm:$0xff] }
 0x3b0   :  { %v1267_v0 = vpack.c.bf16 %v992_v6, %v991_v4 }
 0x3b1   :  { %v552_v16 = vmax.f32 %v547_v14, 0.0 }
 0x3b3   :  { %1152 = vmatprep.subr.msk.mxu0 %vm103_vm3, %v552_v16 }
 0x3b4   :  { %1153 = vmatpush3.msk.msra.mxu0 %vm103_vm3, %v552_v16 }
 0x3b5   :  { %1155 = vmatmul.mubr.msk.f32.vlgmr.msra.gmra.mrb[10].mxu0 %vm556_vm11, %v972_v17  ;;  %1263 = vmatprep.subr.bf16.mxu0 %v1314_v27 }
 0x3b6   :  { %1200 = vmatprep.mubr.msk.f32.mxu0 %vm1315_vm5, %v1316_v35  ;;  %1265 = vmatpush3.bf16.msra.mxu0 %v1264_v5  ;;  %v993_v35 = vld [vmem:[%s1738_s1 + $0x110] sm:$0xff] }
 0x3b7   :  { %1266 = vmatprep.subr.bf16.mxu0 %v1314_v27  ;;  %v1270_v9 = vpack.c.bf16 %v994_v7, %v993_v35 }
 0x3ba   :  { %1268 = vmatpush3.bf16.msra.mxu0 %v1267_v0 }
 0x3bb   :  { %1269 = vmatprep.subr.bf16.mxu0 %v1314_v27 }
 0x3be   :  { %1271 = vmatpush3.bf16.msra.mxu0 %v1270_v9 }
 0x3bf   :  { %1272 = vmatprep.subr.bf16.mxu0 %v1314_v27 }
 0x3c2   :  { %1274 = vmatpush3.bf16.msra.mxu0 %v1273_v12 }
 0x3c3   :  { %1275 = vmatprep.subr.bf16.mxu0 %v1314_v27 }
 0x3c6   :  { %1277 = vmatpush3.bf16.msra.mxu0 %v1276_v24 }
 0x488   :  { %v1156_v32 = vpop.f32.mrb[10].mxu0 }
 0x489   :  { %v632_v34 = vpop.f32.mrb[11].mxu0  ;;  %v644_v36 = vrot.slane %v1156_v32, 1  ;;  %v653_v37 = vrot.slane %v1156_v32, 2  ;;  %v662_v38 = vrot.slane %v1156_v32, 3  ;;  %v671_v39 = vrot.slane %v1156_v32, 4 }
 0x48a   :  { %v643_v40 = vrot.slane %v632_v34, 1  ;;  %v652_v41 = vrot.slane %v632_v34, 2  ;;  %v661_v42 = vrot.slane %v632_v34, 3  ;;  %v670_v43 = vrot.slane %v632_v34, 4 }
 0x48b   :  { %648 = vrot.lane.b32.xlu1 %v644_v36, %s1310_s21 }
 0x48c   :  { %v645_v44 = vsel %vm28_vm0, %v643_v40, %v644_v36  ;;  %v654_v45 = vsel %vm53_vm2, %v652_v41, %v653_v37  ;;  %v663_v46 = vsel %vm78_vm1, %v661_v42, %v662_v38  ;;  %v672_v47 = vsel %vm103_vm3, %v670_v43, %v671_v39 }
 0x48d   :  { %646 = vrot.lane.b32.xlu0 %v645_v44, %s1310_s21 }
 0x48f   :  { %657 = vrot.lane.b32.xlu1 %v653_v37, %s1312_s27 }
 0x491   :  { %655 = vrot.lane.b32.xlu0 %v654_v45, %s1312_s27 }
 0x493   :  { %666 = vrot.lane.b32.xlu1 %v662_v38, %s1311_s22 }
 0x495   :  { %664 = vrot.lane.b32.xlu0 %v663_v46, %s1311_s22 }
 0x497   :  { %675 = vrot.lane.b32.xlu1 %v671_v39, %s1313_s28 }
 0x499   :  { %673 = vrot.lane.b32.xlu0 %v672_v47, %s1313_s28 }
 0x4fd   :  { %v649_v48 = vpop.permute.xlu1 %648 }
 0x4fe   :  { %v680_v55 = vsel %vm128_vm4, %v1156_v32, %v649_v48 }
 0x4ff   :  { %v647_v49 = vpop.permute.xlu0 %646 }
 0x500   :  { %v679_v54 = vsel %vm128_vm4, %v632_v34, %v647_v49  ;;  %v999_v49 = vld [vmem:[%s1739_s2 + $0x3] ss:$0 sm:$0xff] }
 0x501   :  { %v658_v50 = vpop.permute.xlu1 %657 }
 0x502   :  { %v682_v58 = vsel %vm134_vm6, %v680_v55, %v658_v50 }
 0x503   :  { %v656_v51 = vpop.permute.xlu0 %655 }
 0x504   :  { %v681_v56 = vsel %vm134_vm6, %v679_v54, %v656_v51 }
 0x505   :  { %v667_v52 = vpop.permute.xlu1 %666 }
 0x506   :  { %v684_v61 = vsel %vm140_vm7, %v682_v58, %v667_v52 }
 0x507   :  { %v665_v53 = vpop.permute.xlu0 %664 }
 0x508   :  { %v683_v59 = vsel %vm140_vm7, %v681_v56, %v665_v53 }
 0x509   :  { %v676_v57 = vpop.permute.xlu1 %675 }
 0x50a   :  { %v686_v63 = vsel %vm146_vm8, %v684_v61, %v676_v57 }
 0x50b   :  { %v674_v60 = vpop.permute.xlu0 %673 }
 0x50c   :  { %v685_v62 = vsel %vm146_vm8, %v683_v59, %v674_v60 }
 0x50d   :  { %1177 = vmatprep.mubr.msk.f32.mxu1 %vm167_vm9, %v685_v62 }
 0x50e   :  { %1178 = vmatmul.mubr.msk.f32.vlgmr.msra.gmra.mrb[12].mxu1 %vm167_vm9, %v686_v63 }
 0x5e1   :  { %v1179_v1 = vpop.f32.mrb[12].mxu1 }
 0x5e2   :  { %v781_v14 = vadd.f32 %v1179_v1, %v986_v13  ;;  %v775_v15 = vpop.f32.mrb[13].mxu1 }
 0x5e3   :  { %v776_v16 = vadd.f32 %v986_v13, %v775_v15 }
 0x5e4   :  { %v785_v17 = vmax.f32 %v781_v14, 0.0 }
 0x5e5   :  { %v784_v18 = vmax.f32 %v776_v16, 0.0 }
 0x5e6   :  { %v789_v19 = vrot.slane %v785_v17, 1 }
 0x5e7   :  { %v788_v20 = vrot.slane %v784_v18, 1 }
 0x5e8   :  { %v794_v21 = vmax.f32 %v785_v17, %v789_v19 }
 0x5e9   :  { %v790_v8 = vsel %vm28_vm0, %v788_v20, %v789_v19 }
 0x5ea   :  { %802 = vst.msk [vmem:[#allocation2 + $0x8] sm:$0x1] %vm798_vm13, %v794_v21  ;;  %v793_v27 = vmax.f32 %v784_v18, %v790_v8 }
 0x5eb   :  { %803 = vst.msk [vmem:[#allocation2 + $0x7] sm:$0x4] %vm800_vm14, %v794_v21 }
 0x5ec   :  { %799 = vst.msk [vmem:[#allocation2 + $0x2] sm:$0x1] %vm798_vm13, %v793_v27 }
 0x5ed   :  { %801 = vst.msk [vmem:[#allocation2 + $0x1] sm:$0x4] %vm800_vm14, %v793_v27 }
 0x5f2   :  { %v805_v26 = vld [vmem:[#allocation2 + $0x8] sm:$0xf] }
 0x5f3   :  { %v815_v30 = vrot.slane %v805_v26, 2  ;;  %v809_v31 = vrot.slane %v805_v26, 1  ;;  %v827_v37 = vrot.slane %v805_v26, 4  ;;  %v821_v38 = vrot.slane %v805_v26, 3 }
 0x5f4   :  { %v804_v28 = vld [vmem:[#allocation2] sm:$0xff] }
 0x5f5   :  { %v814_v29 = vrot.slane %v804_v28, 2  ;;  %v808_v25 = vrot.slane %v804_v28, 1  ;;  %v826_v34 = vrot.slane %v804_v28, 4  ;;  %v820_v36 = vrot.slane %v804_v28, 3 }
 0x5f7   :  { %v816_v32 = vsel %vm53_vm2, %v814_v29, %v815_v30  ;;  %v810_v33 = vsel %vm28_vm0, %v808_v25, %v809_v31  ;;  %v828_v39 = vsel %vm103_vm3, %v826_v34, %v827_v37  ;;  %v822_v40 = vsel %vm78_vm1, %v820_v36, %v821_v38 }
 0x5f8   :  { %817 = vrot.lane.b32.xlu1 %v816_v32, %s1312_s27  ;;  %811 = vrot.lane.b32.xlu0 %v810_v33, %s1310_s21 }
 0x5fc   :  { %829 = vrot.lane.b32.xlu1 %v828_v39, %s1313_s28  ;;  %823 = vrot.lane.b32.xlu0 %v822_v40, %s1311_s22  ;;  %s1317_s22 = smov [#allocation3]  }
 0x5fd   :  { %s939_s27 = sshll.u32 %s1317_s22, 4  ;;  %s940_s27 = int_to_ptr.vmem [resolvable:$true] %s939_s27 }
 0x5fe   :  { %s1286_s28 = scalar_lea.vmem %s940_s27, 32  ;;  %p1291_p1 = scmp.lt.s32.totalorder %s940_s27, %s940_s27 }
 0x5ff   :  { %p1287_p0 = scmp.ne.s32.totalorder %s940_s27, %s1286_s28  ;;  %p1292_p2 = scmp.lt.s32.totalorder %s1286_s28, %s1286_s28 }
 0x601   :  { %p1293_p3 = por %p1292_p2, %p1291_p1 }
 0x603   :  { %p1294_p4 = pnand %p1293_p3, %p1287_p0 }
 0x66a   :  { %v818_v41 = vpop.permute.xlu1 %817  ;;  %v812_v42 = vpop.permute.xlu0 %811 }
 0x66b   :  { %v832_v43 = vsel %vm128_vm4, %v804_v28, %v812_v42 }
 0x66c   :  { %v833_v45 = vsel %vm134_vm6, %v832_v43, %v818_v41 }
 0x66e   :  { %v830_v44 = vpop.permute.xlu1 %829  ;;  %v824_v46 = vpop.permute.xlu0 %823 }
 0x66f   :  { %v834_v47 = vsel %vm140_vm7, %v833_v45, %v824_v46 }
 0x670   :  { %v835_v48 = vsel %vm146_vm8, %v834_v47, %v830_v44 }
 0x671   :  { %1201 = vmatmul.mubr.msk.f32.vlgmr.msra.gmra.mrb[12].mxu0 %vm167_vm9, %v835_v48 }
 0x744   :  { %v921_v50 = vpop.f32.mrb[12].mxu0 }
 0x745   :  { %v922_v51 = vadd.f32 %v999_v49, %v921_v50  ;;  %v1202_v52 = vpop.f32.mrb[13].mxu0 }
 0x747   :  { %v925_v53 = vmax.f32 %v922_v51, 0.0 }
 0x749   :  { %v927_v54 = vrot.slane %v925_v53, 1 }
 0x74b   :  { %v929_v55 = vmax.f32 %v925_v53, %v927_v54 }
 0x74d   :  { %930 = vst.msk [vmem:[#allocation3] sm:$0x1] %vm798_vm13, %v929_v55 }
 0x74e   :  { %932 = vst.msk [vmem:[#allocation3 - $0x5] sm:$0x40] %vm931_vm15, %v929_v55 }
 0x74f   :  { %1297 = shalt.err (!%p1294_p4)
}
 0x750   :  { %s1298_s6 = scalar_lea.hbm %s1741_s4, 32 }
 0x751   :  { %p1299_p5 = scmp.ne.s32.totalorder %s1741_s4, %s1298_s6  ;;  %p1302_p6 = scmp.lt.u32.totalorder %s1298_s6, %s1741_s4 }
 0x753   :  { %p1304_p7 = pnand %p1302_p6, %p1299_p5 }
 0x755   :  { %1307 = shalt.err (!%p1304_p7)
}
 0x756   :  { %942 = dma.vmem_to_hbm [thread:$0]  %s940_s27, 32, %s1741_s4, [#allocation4]  }
 0x757   :  { %1308 = dma.done.wait [#allocation4], 32  }
 0x758   :  { %1309 = vsyncadd [#allocation4], 4294967264 }
 0x759   :  { %946 = vsyncpa [#allocation4], 1 }

</bundles_post_ra>
